<compile_context>
chip_gen: v7x
topology: tpu7x:2x2x1
jax: 0.10.0
libtpu: 0.0.40
codegen_flags: <defaults>
</compile_context>

<pallas_src>
import functools

import jax
import jax.numpy as jnp
import numpy as np
from jax import lax
from jax.experimental import pallas as pl
from jax.experimental.pallas import tpu as pltpu

BN_EPS = 1e-3   # BatchNorm eps from the module
WS_EPS = 1e-5   # weight-standardization eps


# ---------------- Kernel 1: per-channel batch statistics (training-mode BN) ----------
# grid = (n_groups, per_group); outer axis is "parallel" (megacore), inner is a serial
# reduction.  Each group writes its partial (sum, sum-of-squares) exactly once.
def bn_stats_kernel(x_ref, sum_ref, ssq_ref, acc_sum, acc_ssq):
    @pl.when(pl.program_id(1) == 0)
    def _():
        acc_sum[...] = jnp.zeros_like(acc_sum)
        acc_ssq[...] = jnp.zeros_like(acc_ssq)

    x = x_ref[0]                                          # (H, W, C) f32
    acc_sum[...] += jnp.sum(x, axis=(0, 1))[None, :]
    acc_ssq[...] += jnp.sum(x * x, axis=(0, 1))[None, :]

    # Write the HBM outputs exactly once per group, at the last inner step.
    @pl.when(pl.program_id(1) == pl.num_programs(1) - 1)
    def _():
        sum_ref[0] = acc_sum[...]
        ssq_ref[0] = acc_ssq[...]
    # TODO(synk): E[x^2]-E[x]^2 can cancel in f32 for large-mean/low-var activations;
    # switch to a two-pass / Welford-style reduction beyond demo scale.
    # TODO(synk): for large H*W, move the two reductions onto the otherwise-idle MXU
    # (dot a ones row against x reshaped (H*W, Cin)) instead of the VPU/XLU sums.


# ---------------- Kernel 2: fused BN + ReLU + pad + conv (stride=1 / dilation=1) ------
def fused_bn_relu_conv_kernel(x_ref, scale_ref, shift_ref, w_ref, b_ref, o_ref,
                              xpad_ref, *, kh_size, kw_size, pad, h_out, w_out):
    h, w, cin = x_ref.shape[1], x_ref.shape[2], x_ref.shape[3]
    hp, wp = h + 2 * pad, w + 2 * pad
    cout_pad = b_ref.shape[1]
    m = h_out * w_out

    # Border-only zero fill: the interior is fully overwritten by the BN+ReLU write
    # below, so only the pad-wide frame needs zeroing (done every grid step; cheap and
    # correct under megacore sharding, where each core has its own scratch instance).
    if pad > 0:
        xpad_ref[0:pad, :, :] = jnp.zeros((pad, wp, cin), jnp.float32)
        xpad_ref[pad + h:hp, :, :] = jnp.zeros((pad, wp, cin), jnp.float32)
        xpad_ref[pad:pad + h, 0:pad, :] = jnp.zeros((h, pad, cin), jnp.float32)
        xpad_ref[pad:pad + h, pad + w:wp, :] = jnp.zeros((h, pad, cin), jnp.float32)

    # Fused training-mode BatchNorm (affine) + ReLU applied to the tile in VMEM,
    # written straight into the padded scratch -> no extra HBM traffic for `y`.
    y = jnp.maximum(x_ref[0] * scale_ref[0] + shift_ref[0], 0.0)
    xpad_ref[pad:pad + h, pad:pad + w, :] = y

    # Conv as KH*KW accumulating tap matmuls.  Cin stays on lanes for every tap load
    # (no im2col scratch, no Cin-wide masked strip stores, no relayouting reshapes),
    # accumulation happens in the f32 VMEM output block initialized with the bias.
    o_ref[...] = jnp.broadcast_to(b_ref[...], (m, cout_pad))[None]
    for kh in range(kh_size):
        for kw in range(kw_size):
            patch = xpad_ref[kh:kh + h_out, kw:kw + w_out, :]       # (Hout, Wout, Cin)
            lhs = patch.reshape(m, cin)                             # Cin stays on lanes
            # TODO(synk): at production Cin/Cout, cast lhs / w_ref to bf16 (keep the
            # f32 accumulate) for 2x MXU rate on v6e/v7x; kept f32 here to preserve
            # the f32 conv numerics of the reference.
            o_ref[0] += jnp.dot(lhs, w_ref[kh * kw_size + kw],
                                preferred_element_type=jnp.float32)


# ---------------- Wrapper (NHWC core) ---------------------------------------------------
def my_conv_forward_nhwc(x_nhwc, weight, bias, gamma, beta, *,
                         stride=1, padding=0, dilation=1):
    # TODO(synk): general stride/dilation would need strided tap slicing; demo uses 1/1.
    assert stride == 1 and dilation == 1
    n, h, w, cin = x_nhwc.shape
    cout, _, kh, kw = weight.shape
    x = x_nhwc.astype(jnp.float32)

    # ---- batch statistics: parallel group axis + serial per-group reduction ----
    n_groups = 2 if (n >= 2 and n % 2 == 0) else 1      # uses v7x's 2nd TC; no-op v5e/v6e
    per_group = n // n_groups
    sums_g, ssqs_g = pl.pallas_call(
        bn_stats_kernel,
        out_shape=(jax.ShapeDtypeStruct((n_groups, 1, cin), jnp.float32),
                   jax.ShapeDtypeStruct((n_groups, 1, cin), jnp.float32)),
        grid=(n_groups, per_group),
        in_specs=[pl.BlockSpec((1, h, w, cin),
                               lambda g, i: (g * per_group + i, 0, 0, 0))],
        out_specs=(pl.BlockSpec((1, 1, cin), lambda g, i: (g, 0, 0)),
                   pl.BlockSpec((1, 1, cin), lambda g, i: (g, 0, 0))),
        scratch_shapes=[pltpu.VMEM((1, cin), jnp.float32),
                        pltpu.VMEM((1, cin), jnp.float32)],
        compiler_params=pltpu.CompilerParams(
            dimension_semantics=("parallel", "arbitrary")),
    )(x)
    count = n * h * w
    mean = jnp.sum(sums_g[:, 0, :], axis=0) / count
    var = jnp.maximum(jnp.sum(ssqs_g[:, 0, :], axis=0) / count - mean * mean, 0.0)
    scale = gamma.astype(jnp.float32) / jnp.sqrt(var + BN_EPS)     # biased var (PyTorch)
    shift = beta.astype(jnp.float32) - mean * scale

    # ---- weight standardization (tiny tensor: plain JAX, folded into layout prep) ----
    wf = weight.astype(jnp.float32)
    wm = jnp.mean(wf, axis=(1, 2, 3), keepdims=True)
    wc = wf - wm
    std = jnp.std(wc.reshape(cout, -1), axis=1, ddof=1).reshape(cout, 1, 1, 1)  # unbiased
    ws = wc / (std + WS_EPS)
    # (Cout,Cin,KH,KW) -> (KH,KW,Cin,Cout) -> (KH*KW, Cin, Cout_pad): one (Cin, Cout_pad)
    # matrix per tap; Cout lane-padded to 128 so the output store is unmasked.
    cout_pad = ((cout + 127) // 128) * 128
    w_taps = jnp.transpose(ws, (2, 3, 1, 0)).reshape(kh * kw, cin, cout)
    w_taps = jnp.pad(w_taps, ((0, 0), (0, 0), (0, cout_pad - cout)))
    b_pad = jnp.pad(bias.astype(jnp.float32), (0, cout_pad - cout))[None]

    # ---- fused BN + ReLU + pad + conv ----
    hp, wp = h + 2 * padding, w + 2 * padding
    h_out, w_out = hp - kh + 1, wp - kw + 1
    m = h_out * w_out                                   # multiple of 8 at these shapes
    kernel = functools.partial(fused_bn_relu_conv_kernel, kh_size=kh, kw_size=kw,
                               pad=padding, h_out=h_out, w_out=w_out)
    # TODO(synk): at production H/W/Cin (especially v7x's 64 MiB VMEM) add a spatial
    # grid axis over Hout row blocks with a (KH-1)-row halo and re-budget the tile
    # sizes / vmem_limit_bytes; per-image full-frame scratches only fit demo scale.
    out = pl.pallas_call(
        kernel,
        out_shape=jax.ShapeDtypeStruct((n, m, cout_pad), jnp.float32),
        grid=(n,),
        in_specs=[pl.BlockSpec((1, h, w, cin), lambda i: (i, 0, 0, 0)),
                  pl.BlockSpec((1, cin), lambda i: (0, 0)),
                  pl.BlockSpec((1, cin), lambda i: (0, 0)),
                  pl.BlockSpec((kh * kw, cin, cout_pad), lambda i: (0, 0, 0)),
                  pl.BlockSpec((1, cout_pad), lambda i: (0, 0))],
        out_specs=pl.BlockSpec((1, m, cout_pad), lambda i: (i, 0, 0)),
        scratch_shapes=[pltpu.VMEM((hp, wp, cin), jnp.float32)],
        compiler_params=pltpu.CompilerParams(
            dimension_semantics=("parallel",),
            vmem_limit_bytes=48 * 1024 * 1024),
    )(x, scale[None], shift[None], w_taps, b_pad)

    # TODO(synk): if the surrounding model keeps Cout a multiple of 128, this slice /
    # reshape (an extra XLA HBM pass) disappears and the slab is consumed directly.
    return out[:, :, :cout].reshape(n, h_out, w_out, cout)


def my_conv_forward(x_nchw, weight, bias, gamma, beta, *,
                    stride=1, padding=0, dilation=1):
    # NCHW adapter matching the PyTorch module signature.  Each transpose is a full
    # HBM relayout pass; production callers should stay NHWC and call
    # my_conv_forward_nhwc directly.
    x_nhwc = jnp.transpose(x_nchw, (0, 2, 3, 1))
    out = my_conv_forward_nhwc(x_nhwc, weight, bias, gamma, beta,
                               stride=stride, padding=padding, dilation=dilation)
    return jnp.transpose(out, (0, 3, 1, 2))


# ---------------- Pure-JAX reference (mirrors the PyTorch forward) ---------------------
def reference(x_nchw, weight, bias, gamma, beta, padding):
    mean = jnp.mean(x_nchw, axis=(0, 2, 3))
    var = jnp.var(x_nchw, axis=(0, 2, 3))                       # biased
    xn = (x_nchw - mean[None, :, None, None]) / jnp.sqrt(var + BN_EPS)[None, :, None, None]
    y = jnp.maximum(xn * gamma[None, :, None, None] + beta[None, :, None, None], 0.0)
    wm = jnp.mean(weight, axis=(1, 2, 3), keepdims=True)
    wc = weight - wm
    std = jnp.std(wc.reshape(weight.shape[0], -1), axis=1, ddof=1).reshape(-1, 1, 1, 1)
    ws = wc / (std + WS_EPS)
    out = lax.conv_general_dilated(y, ws, window_strides=(1, 1),
                                   padding=[(padding, padding), (padding, padding)],
                                   dimension_numbers=("NCHW", "OIHW", "NCHW"))
    return out + bias[None, :, None, None]


if __name__ == "__main__":
    N, Cin, Cout, H, W, K, PAD = 2, 4, 8, 16, 16, 3, 1

    key = jax.random.PRNGKey(0)
    kx, kw_, kb, kg, kbt = jax.random.split(key, 5)
    x = jax.random.normal(kx, (N, Cin, H, W), dtype=jnp.float32)          # NCHW input
    weight = 0.1 * jax.random.normal(kw_, (Cout, Cin, K, K), dtype=jnp.float32)
    bias = 0.05 * jax.random.normal(kb, (Cout,), dtype=jnp.float32)
    gamma = 1.0 + 0.1 * jax.random.normal(kg, (Cin,), dtype=jnp.float32)   # BN weight
    beta = 0.1 * jax.random.normal(kbt, (Cin,), dtype=jnp.float32)         # BN bias

    out = my_conv_forward(x, weight, bias, gamma, beta, stride=1, padding=PAD, dilation=1)
    out = jax.block_until_ready(out)

    ref = reference(x, weight, bias, gamma, beta, PAD)
    np.testing.assert_allclose(np.asarray(out), np.asarray(ref), rtol=1e-3, atol=1e-3)

    print("KERNEL_OK")
</pallas_src>

<mosaic_0001>
module attributes {stable_mosaic.version = 11 : i64} {
  func.func @bn_stats_kernel(%arg0: i32, %arg1: i32, %arg2: memref<1x16x16x4xf32, #tpu.memory_space<vmem>>, %arg3: memref<1x1x4xf32, #tpu.memory_space<vmem>>, %arg4: memref<1x1x4xf32, #tpu.memory_space<vmem>>, %arg5: memref<1x4xf32, #tpu.memory_space<vmem>>, %arg6: memref<1x4xf32, #tpu.memory_space<vmem>>) attributes {dimension_semantics = [#tpu.dimension_semantics<parallel>, #tpu.dimension_semantics<arbitrary>], iteration_bounds = array<i64: 2, 1>, scalar_prefetch = 0 : i64, scratch_operands = 2 : i64, tpu.core_type = #tpu.core_type<tc>, window_params = [{transform_indices = @transform_0, window_bounds = array<i64: 1, 16, 16, 4>}, {transform_indices = @transform_1, window_bounds = array<i64: 1, 1, 4>}, {transform_indices = @transform_2, window_bounds = array<i64: 1, 1, 4>}]} {
    %c0_i32 = arith.constant 0 : i32
    %0 = arith.cmpi eq, %arg1, %c0_i32 : i32
    %1 = arith.extui %0 : i1 to i32
    %c0_i32_0 = arith.constant 0 : i32
    %2 = arith.cmpi ne, %1, %c0_i32_0 : i32
    scf.if %2 {
      %cst_15 = arith.constant 0.000000e+00 : f32
      %19 = vector.broadcast %cst_15 : f32 to vector<1x4xf32>
      %c0_16 = arith.constant 0 : index
      %c0_17 = arith.constant 0 : index
      %20 = vector.load %arg5[%c0_16, %c0_17] : memref<1x4xf32, #tpu.memory_space<vmem>>, vector<1x4xf32>
      tpu.vector_store %arg5[%c0_16, %c0_17], %19 {strides = array<i32>} : memref<1x4xf32, #tpu.memory_space<vmem>>, vector<1x4xf32>,
      %cst_18 = arith.constant 0.000000e+00 : f32
      %21 = vector.broadcast %cst_18 : f32 to vector<1x4xf32>
      %c0_19 = arith.constant 0 : index
      %c0_20 = arith.constant 0 : index
      %22 = vector.load %arg6[%c0_19, %c0_20] : memref<1x4xf32, #tpu.memory_space<vmem>>, vector<1x4xf32>
      tpu.vector_store %arg6[%c0_19, %c0_20], %21 {strides = array<i32>} : memref<1x4xf32, #tpu.memory_space<vmem>>, vector<1x4xf32>,
    } else {
    }
    %c0 = arith.constant 0 : index
    %c0_1 = arith.constant 0 : index
    %c0_2 = arith.constant 0 : index
    %c0_3 = arith.constant 0 : index
    %3 = vector.load %arg2[%c0, %c0_1, %c0_2, %c0_3] : memref<1x16x16x4xf32, #tpu.memory_space<vmem>>, vector<1x16x16x4xf32>
    %4 = vector.shape_cast %3 : vector<1x16x16x4xf32> to vector<16x16x4xf32>
    %c0_4 = arith.constant 0 : index
    %c0_5 = arith.constant 0 : index
    %5 = vector.load %arg5[%c0_4, %c0_5] : memref<1x4xf32, #tpu.memory_space<vmem>>, vector<1x4xf32>
    %cst = arith.constant dense<0.000000e+00> : vector<4xf32>
    %6 = vector.multi_reduction <add>, %4, %cst [0, 1] : vector<16x16x4xf32> to vector<4xf32>
    %7 = vector.shape_cast %6 : vector<4xf32> to vector<1x4xf32>
    %8 = arith.addf %5, %7 : vector<1x4xf32>
    %c0_6 = arith.constant 0 : index
    %c0_7 = arith.constant 0 : index
    %9 = vector.load %arg5[%c0_6, %c0_7] : memref<1x4xf32, #tpu.memory_space<vmem>>, vector<1x4xf32>
    tpu.vector_store %arg5[%c0_6, %c0_7], %8 {strides = array<i32>} : memref<1x4xf32, #tpu.memory_space<vmem>>, vector<1x4xf32>,
    %c0_8 = arith.constant 0 : index
    %c0_9 = arith.constant 0 : index
    %10 = vector.load %arg6[%c0_8, %c0_9] : memref<1x4xf32, #tpu.memory_space<vmem>>, vector<1x4xf32>
    %11 = arith.mulf %4, %4 : vector<16x16x4xf32>
    %cst_10 = arith.constant dense<0.000000e+00> : vector<4xf32>
    %12 = vector.multi_reduction <add>, %11, %cst_10 [0, 1] : vector<16x16x4xf32> to vector<4xf32>
    %13 = vector.shape_cast %12 : vector<4xf32> to vector<1x4xf32>
    %14 = arith.addf %10, %13 : vector<1x4xf32>
    %c0_11 = arith.constant 0 : index
    %c0_12 = arith.constant 0 : index
    %15 = vector.load %arg6[%c0_11, %c0_12] : memref<1x4xf32, #tpu.memory_space<vmem>>, vector<1x4xf32>
    tpu.vector_store %arg6[%c0_11, %c0_12], %14 {strides = array<i32>} : memref<1x4xf32, #tpu.memory_space<vmem>>, vector<1x4xf32>,
    %c0_i32_13 = arith.constant 0 : i32
    %16 = arith.cmpi eq, %arg1, %c0_i32_13 : i32
    %17 = arith.extui %16 : i1 to i32
    %c0_i32_14 = arith.constant 0 : i32
    %18 = arith.cmpi ne, %17, %c0_i32_14 : i32
    scf.if %18 {
      %c0_15 = arith.constant 0 : index
      %c0_16 = arith.constant 0 : index
      %19 = vector.load %arg5[%c0_15, %c0_16] : memref<1x4xf32, #tpu.memory_space<vmem>>, vector<1x4xf32>
      %c0_17 = arith.constant 0 : index
      %c0_18 = arith.constant 0 : index
      %c0_19 = arith.constant 0 : index
      %20 = vector.load %arg3[%c0_17, %c0_18, %c0_19] : memref<1x1x4xf32, #tpu.memory_space<vmem>>, vector<1x1x4xf32>
      %21 = vector.shape_cast %20 : vector<1x1x4xf32> to vector<1x4xf32>
      %22 = vector.shape_cast %19 : vector<1x4xf32> to vector<1x1x4xf32>
      tpu.vector_store %arg3[%c0_17, %c0_18, %c0_19], %22 {strides = array<i32>} : memref<1x1x4xf32, #tpu.memory_space<vmem>>, vector<1x1x4xf32>,
      %c0_20 = arith.constant 0 : index
      %c0_21 = arith.constant 0 : index
      %23 = vector.load %arg6[%c0_20, %c0_21] : memref<1x4xf32, #tpu.memory_space<vmem>>, vector<1x4xf32>
      %c0_22 = arith.constant 0 : index
      %c0_23 = arith.constant 0 : index
      %c0_24 = arith.constant 0 : index
      %24 = vector.load %arg4[%c0_22, %c0_23, %c0_24] : memref<1x1x4xf32, #tpu.memory_space<vmem>>, vector<1x1x4xf32>
      %25 = vector.shape_cast %24 : vector<1x1x4xf32> to vector<1x4xf32>
      %26 = vector.shape_cast %23 : vector<1x4xf32> to vector<1x1x4xf32>
      tpu.vector_store %arg4[%c0_22, %c0_23, %c0_24], %26 {strides = array<i32>} : memref<1x1x4xf32, #tpu.memory_space<vmem>>, vector<1x1x4xf32>,
    } else {
    }
    return
  }
  func.func @transform_0(%arg0: i32, %arg1: i32) -> (i32, i32, i32, i32) {
    %c1_i32 = arith.constant 1 : i32
    %0 = arith.muli %arg0, %c1_i32 : i32
    %1 = arith.addi %0, %arg1 : i32
    %c0_i32 = arith.constant 0 : i32
    %c0_i32_0 = arith.constant 0 : i32
    %c0_i32_1 = arith.constant 0 : i32
    %c0_i32_2 = arith.constant 0 : i32
    return %1, %c0_i32, %c0_i32_0, %c0_i32_1 : i32, i32, i32, i32
  }
  func.func @transform_1(%arg0: i32, %arg1: i32) -> (i32, i32, i32) {
    %c0_i32 = arith.constant 0 : i32
    %c0_i32_0 = arith.constant 0 : i32
    %c0_i32_1 = arith.constant 0 : i32
    return %arg0, %c0_i32, %c0_i32_0 : i32, i32, i32
  }
  func.func @transform_2(%arg0: i32, %arg1: i32) -> (i32, i32, i32) {
    %c0_i32 = arith.constant 0 : i32
    %c0_i32_0 = arith.constant 0 : i32
    %c0_i32_1 = arith.constant 0 : i32
    return %arg0, %c0_i32, %c0_i32_0 : i32, i32, i32
  }
}

</mosaic_0001>

<bundles_post_ra>
// kernel: tpu_custom_call.1
= control target key start
LH: loop header
LB: loop body
LE: loop exit
PB: predicated region body
PF: predicated region fallthrough
CT: control target
= control target key end

     0   :  { %8 = vsyncpa [#allocation5], 0  ;;  %s972_s0 = inlined_call_operand.vmem [shape: f32[2,16,16,4], index: 0, kind: input, shape index: {}]   ;;  %s973_s1 = inlined_call_operand.hbm [shape: f32[2,1,4], index: 1, kind: output, shape index: {0}]   ;;  %s974_s2 = inlined_call_operand.hbm [shape: f32[2,1,4], index: 2, kind: output, shape index: {1}]  }
   0x1   :  { %10 = vsyncpa [#allocation5 + $0x1], 0 }
   0x2   :  { %11 = vsyncpa [#allocation7], 0 }
   0x3   :  { %13 = vsyncpa [#allocation7 + $0x1], 0  ;;  %s718_s9 = smov 0   ;;  %s720_s10 = smov 0  }
   0x4   :  { %s722_s11 = smov 0   ;;  %s724_s12 = smov 0  }
   0x5   :  { %s726_s13 = smov 0   ;;  %s728_s14 = smov 0  }
   0x6 LB: > { %s515_s15 = sadd.s32 4294967295, %s698_s14   ;;  %s516_s16 = sadd.s32 4294967294, %s698_s14   ;;  %s698_s14 = sphi %s728_s14, %s19_s14   ;;  %s694_s13 = sphi %s726_s13, %s981_s13   ;;  %s690_s12 = sphi %s724_s12, %s980_s12   ;;  %s686_s11 = sphi %s722_s11, %s979_s11   ;;  %s682_s10 = sphi %s720_s10, %s978_s10   ;;  %s678_s9 = sphi %s718_s9, %s977_s9  }
   0x7   : > { %s31_s17 = sadd.s32 1, %s694_s13  ;;  %s66_s18 = sadd.s32 1, %s686_s11 }
   0x8   : > { %p33_p0 = scmp.ge.s32.totalorder %s31_s17, 2  ;;  %p76_p1 = scmp.ne.s32.totalorder %s686_s11, %s682_s10 }
   0x9   : > { %p77_p2 = scmp.eq.s32.totalorder %s515_s15, 1  ;;  %p82_p3 = scmp.ne.s32.totalorder %s682_s10, %s678_s9 }
   0xa   : > { %s983_s17 = smov (%p33_p0, %s31_s17), 0  ;;  %p83_p5 = scmp.eq.s32.totalorder %s516_s16, 1 }
   0xb   : > { %p758_p4 = por %p77_p2, %p76_p1  ;;  %s63_s20 = ssub.s32 %s694_s13, %s983_s17 }
   0xc   : > { %p519_p6 = scmp.ge.s32.totalorder %s698_s14, 1  ;;  %p64_p7 = scmp.eq.s32.totalorder %s63_s20, 0 }
   0xd   : > { %p765_p8 = por %p83_p5, %p82_p3  ;;  %p137_p9 = scmp.lt.s32.totalorder %s698_s14, 3 }
   0xe   : > { %s771_s22 = scalar_select %p64_p7, %s686_s11, %s66_s18  }
   0xf   : > { %p138_p10 = pnand %p519_p6, %p137_p9 }
  0x10   : > { %vm174_vm0 = vcmask (!%p138_p10), 24576   ;;  %p164_p11 = scmp.lt.s32.totalorder (!%p138_p10), %s690_s12, 1  ;;  %v700_v0 = vmov (!%p138_p10), 0.0   ;;  %vm210_vm1 = vcmask (!%p138_p10), 31744   ;;  %s877_s28 = sand.u32 (!%p138_p10), 1, %s682_s10  }
  0x11   : > { %141 = sbr.rel (%p138_p10) target bundleno = 157 (0x9d), region = 24  ;;  %175 = vst.msk [vmem:[#allocation2] sm:$0x1] (!%p138_p10), %vm174_vm0, %v700_v0  ;;  %176 = vst.msk [vmem:[#allocation3] sm:$0x1] (!%p138_p10), %vm174_vm0, %v700_v0  ;;  %s156_s29 = scalar_lea.vmem (!%p138_p10), [#allocation4], %s877_s28 }
  0x12   : > { %s411_s30 = sshll.u32 (!%p138_p10), %s156_s29, 4  ;;  %s522_s3 = sshll.u32 (!%p138_p10), %s690_s12, 4  ;;  %s884_s30 = int_to_ptr.vmem [resolvable:$true] %s411_s30 }
  0x13   : > { %s891_s6 = scalar_lea.hbm (!%p138_p10), %s973_s1, %s522_s3  ;;  %s395_s7 = scalar_lea.sflag (!%p138_p10), [#allocation5], %s877_s28 }
  0x14   : > { %s588_s8 = scalar_lea.vmem (!%p138_p10), %s884_s30, 16  ;;  %s701_s15 = smov (!%p138_p10), [#allocation4]  }
  0x15   : > { %p589_p12 = scmp.ne.s32.totalorder (!%p138_p10), %s884_s30, %s588_s8  ;;  %s592_s16 = sshll.u32 (!%p138_p10), %s701_s15, 4  ;;  %s593_s16 = int_to_ptr.vmem [resolvable:$false] %s592_s16 }
  0x16   : > { %s594_s18 = scalar_lea.vmem (!%p138_p10), %s593_s16, 32  ;;  %p595_p1 = scmp.lt.s32.totalorder (!%p138_p10), %s884_s30, %s593_s16 }
  0x17   : > { %p590_p13 = pnand (!%p138_p10), %p589_p12, %p758_p4  ;;  %p596_p2 = scmp.lt.s32.totalorder (!%p138_p10), %s594_s18, %s588_s8 }
  0x18   : > { %s165_s23 = scalar_select %p164_p11, %s690_s12, 1 }
  0x19   : > { %p591_p0 = pneg %p590_p13  ;;  %p597_p3 = por %p596_p2, %p595_p1 }
  0x1a   : > { %s526_s24 = sshll.u32 %s165_s23, 8 }
  0x1b   : > { %s780_s27 = scalar_lea.vmem %s972_s0, %s526_s24  ;;  %p598_p5 = pnand %p597_p3, %p591_p0 }
  0x1c   : > { %v177_v1 = vld [vmem:[%s780_s27] sm:$0xff]  ;;  %v178_v2 = vld [vmem:[%s780_s27 + $0x8] sm:$0xff]  ;;  %v179_v3 = vld [vmem:[%s780_s27 + $0x10] sm:$0xff] }
  0x1d   : > { %v211_v4 = vsel %vm210_vm1, %v177_v1, 0.0  ;;  %v212_v5 = vsel %vm210_vm1, %v178_v2, 0.0  ;;  %v214_v6 = vsel %vm210_vm1, %v179_v3, 0.0  ;;  %v180_v7 = vld [vmem:[%s780_s27 + $0x18] sm:$0xff]  ;;  %v181_v10 = vld [vmem:[%s780_s27 + $0x20] sm:$0xff]  ;;  %v182_v13 = vld [vmem:[%s780_s27 + $0x28] sm:$0xff]  ;;  %v284_v28 = vmul.f32 %v177_v1, %v177_v1 }
  0x1e   : > { %v213_v8 = vadd.f32 %v212_v5, %v211_v4  ;;  %v216_v9 = vsel %vm210_vm1, %v180_v7, 0.0  ;;  %v218_v12 = vsel %vm210_vm1, %v181_v10, 0.0  ;;  %v220_v15 = vsel %vm210_vm1, %v182_v13, 0.0  ;;  %v183_v16 = vld [vmem:[%s780_s27 + $0x30] sm:$0xff]  ;;  %v184_v19 = vld [vmem:[%s780_s27 + $0x38] sm:$0xff]  ;;  %v185_v22 = vld [vmem:[%s780_s27 + $0x40] sm:$0xff] }
  0x1f   : > { %v222_v18 = vsel %vm210_vm1, %v183_v16, 0.0  ;;  %v224_v21 = vsel %vm210_vm1, %v184_v19, 0.0  ;;  %v226_v24 = vsel %vm210_vm1, %v185_v22, 0.0  ;;  %v186_v25 = vld [vmem:[%s780_s27 + $0x48] sm:$0xff]  ;;  %v285_v29 = vmul.f32 %v178_v2, %v178_v2  ;;  %v187_v31 = vld [vmem:[%s780_s27 + $0x50] sm:$0xff]  ;;  %v188_v33 = vld [vmem:[%s780_s27 + $0x58] sm:$0xff] }
  0x20   : > { %v215_v11 = vadd.f32 %v214_v6, %v213_v8  ;;  %v228_v27 = vsel %vm210_vm1, %v186_v25, 0.0  ;;  %v286_v30 = vmul.f32 %v179_v3, %v179_v3  ;;  %v230_v34 = vsel %vm210_vm1, %v187_v31, 0.0  ;;  %v189_v42 = vld [vmem:[%s780_s27 + $0x60] sm:$0xff]  ;;  %v190_v48 = vld [vmem:[%s780_s27 + $0x68] sm:$0xff]  ;;  %v191_v54 = vld [vmem:[%s780_s27 + $0x70] sm:$0xff] }
  0x21   : > { %v287_v35 = vmul.f32 %v180_v7, %v180_v7  ;;  %v232_v37 = vsel %vm210_vm1, %v188_v33, 0.0  ;;  %v288_v38 = vmul.f32 %v181_v10, %v181_v10  ;;  %v316_v39 = vsel %vm210_vm1, %v284_v28, 0.0  ;;  %v192_v60 = vld [vmem:[%s780_s27 + $0x78] sm:$0xff]  ;;  %v193_v2 = vld [vmem:[%s780_s27 + $0x80] sm:$0xff]  ;;  %v194_v8 = vld [vmem:[%s780_s27 + $0x88] sm:$0xff] }
  0x22   : > { %v217_v14 = vadd.f32 %v216_v9, %v215_v11  ;;  %v317_v40 = vsel %vm210_vm1, %v285_v29, 0.0  ;;  %v319_v41 = vsel %vm210_vm1, %v286_v30, 0.0  ;;  %v234_v45 = vsel %vm210_vm1, %v189_v42, 0.0 }
  0x23   : > { %v318_v44 = vadd.f32 %v317_v40, %v316_v39  ;;  %v289_v46 = vmul.f32 %v182_v13, %v182_v13  ;;  %v321_v47 = vsel %vm210_vm1, %v287_v35, 0.0  ;;  %v236_v51 = vsel %vm210_vm1, %v190_v48, 0.0 }
  0x24   : > { %v219_v17 = vadd.f32 %v218_v12, %v217_v14  ;;  %v290_v52 = vmul.f32 %v183_v16, %v183_v16  ;;  %v323_v53 = vsel %vm210_vm1, %v288_v38, 0.0  ;;  %v238_v57 = vsel %vm210_vm1, %v191_v54, 0.0  ;;  %v195_v14 = vld [vmem:[%s780_s27 + $0x90] sm:$0xff] }
  0x25   : > { %v320_v50 = vadd.f32 %v319_v41, %v318_v44  ;;  %v291_v58 = vmul.f32 %v184_v19, %v184_v19  ;;  %v325_v59 = vsel %vm210_vm1, %v289_v46, 0.0  ;;  %v240_v63 = vsel %vm210_vm1, %v192_v60, 0.0  ;;  %v199_v38 = vld [vmem:[%s780_s27 + $0xb0] sm:$0xff]  ;;  %v200_v44 = vld [vmem:[%s780_s27 + $0xb8] sm:$0xff] }
  0x26   : > { %v221_v20 = vadd.f32 %v220_v15, %v219_v17  ;;  %v292_v0 = vmul.f32 %v185_v22, %v185_v22  ;;  %v327_v1 = vsel %vm210_vm1, %v290_v52, 0.0  ;;  %v242_v5 = vsel %vm210_vm1, %v193_v2, 0.0 }
  0x27   : > { %v322_v56 = vadd.f32 %v321_v47, %v320_v50  ;;  %v293_v6 = vmul.f32 %v186_v25, %v186_v25  ;;  %v329_v7 = vsel %vm210_vm1, %v291_v58, 0.0  ;;  %v244_v11 = vsel %vm210_vm1, %v194_v8, 0.0  ;;  %v201_v50 = vld [vmem:[%s780_s27 + $0xc0] sm:$0xff] }
  0x28   : > { %v223_v23 = vadd.f32 %v222_v18, %v221_v20  ;;  %v294_v12 = vmul.f32 %v187_v31, %v187_v31  ;;  %v331_v13 = vsel %vm210_vm1, %v292_v0, 0.0  ;;  %v246_v17 = vsel %vm210_vm1, %v195_v14, 0.0  ;;  %v196_v20 = vld [vmem:[%s780_s27 + $0x98] sm:$0xff] }
  0x29   : > { %v324_v62 = vadd.f32 %v323_v53, %v322_v56  ;;  %v295_v18 = vmul.f32 %v188_v33, %v188_v33  ;;  %v333_v19 = vsel %vm210_vm1, %v293_v6, 0.0  ;;  %v297_v30 = vmul.f32 %v190_v48, %v190_v48  ;;  %v202_v56 = vld [vmem:[%s780_s27 + $0xc8] sm:$0xff] }
  0x2a   : > { %v225_v26 = vadd.f32 %v224_v21, %v223_v23  ;;  %v248_v23 = vsel %vm210_vm1, %v196_v20, 0.0  ;;  %v335_v25 = vsel %vm210_vm1, %v294_v12, 0.0  ;;  %v254_v41 = vsel %vm210_vm1, %v199_v38, 0.0 }
  0x2b   : > { %v326_v4 = vadd.f32 %v325_v59, %v324_v62  ;;  %v337_v31 = vsel %vm210_vm1, %v295_v18, 0.0  ;;  %v256_v47 = vsel %vm210_vm1, %v200_v44, 0.0  ;;  %v300_v48 = vmul.f32 %v193_v2, %v193_v2  ;;  %v203_v62 = vld [vmem:[%s780_s27 + $0xd0] sm:$0xff] }
  0x2c   : > { %v227_v32 = vadd.f32 %v226_v24, %v225_v26  ;;  %v296_v24 = vmul.f32 %v189_v42, %v189_v42  ;;  %v197_v26 = vld [vmem:[%s780_s27 + $0xa0] sm:$0xff]  ;;  %v299_v42 = vmul.f32 %v192_v60, %v192_v60  ;;  %v258_v53 = vsel %vm210_vm1, %v201_v50, 0.0 }
  0x2d   : > { %v328_v10 = vadd.f32 %v327_v1, %v326_v4  ;;  %v250_v29 = vsel %vm210_vm1, %v197_v26, 0.0  ;;  %v260_v59 = vsel %vm210_vm1, %v202_v56, 0.0  ;;  %v302_v60 = vmul.f32 %v195_v14, %v195_v14  ;;  %v204_v4 = vld [vmem:[%s780_s27 + $0xd8] sm:$0xff] }
  0x2e   : > { %v229_v36 = vadd.f32 %v228_v27, %v227_v32  ;;  %v198_v32 = vld [vmem:[%s780_s27 + $0xa8] sm:$0xff]  ;;  %v262_v1 = vsel %vm210_vm1, %v203_v62, 0.0  ;;  %v303_v2 = vmul.f32 %v196_v20, %v196_v20  ;;  %v306_v20 = vmul.f32 %v199_v38, %v199_v38 }
  0x2f   : > { %v330_v16 = vadd.f32 %v329_v7, %v328_v10  ;;  %v252_v35 = vsel %vm210_vm1, %v198_v32, 0.0  ;;  %v264_v7 = vsel %vm210_vm1, %v204_v4, 0.0  ;;  %v205_v10 = vld [vmem:[%s780_s27 + $0xe0] sm:$0xff]  ;;  %v305_v14 = vmul.f32 %v198_v32, %v198_v32 }
  0x30   : > { %v231_v43 = vadd.f32 %v230_v34, %v229_v36  ;;  %v298_v36 = vmul.f32 %v191_v54, %v191_v54  ;;  %v301_v54 = vmul.f32 %v194_v8, %v194_v8  ;;  %v304_v8 = vmul.f32 %v197_v26, %v197_v26 }
  0x31   : > { %v332_v22 = vadd.f32 %v331_v13, %v330_v16  ;;  %v266_v13 = vsel %vm210_vm1, %v205_v10, 0.0  ;;  %v206_v16 = vld [vmem:[%s780_s27 + $0xe8] sm:$0xff]  ;;  %v307_v26 = vmul.f32 %v200_v44, %v200_v44  ;;  %v308_v32 = vmul.f32 %v201_v50, %v201_v50 }
  0x32   : > { %v233_v49 = vadd.f32 %v232_v37, %v231_v43  ;;  %v339_v37 = vsel %vm210_vm1, %v296_v24, 0.0  ;;  %v341_v43 = vsel %vm210_vm1, %v297_v30, 0.0  ;;  %v311_v44 = vmul.f32 %v204_v4, %v204_v4 }
  0x33   : > { %v334_v28 = vadd.f32 %v333_v19, %v332_v22  ;;  %v268_v19 = vsel %vm210_vm1, %v206_v16, 0.0  ;;  %v207_v22 = vld [vmem:[%s780_s27 + $0xf0] sm:$0xff] }
  0x34   : > { %v235_v55 = vadd.f32 %v234_v45, %v233_v49  ;;  %v343_v49 = vsel %vm210_vm1, %v298_v36, 0.0  ;;  %v309_v36 = vmul.f32 %v202_v56, %v202_v56  ;;  %v314_v56 = vmul.f32 %v207_v22, %v207_v22 }
  0x35   : > { %v336_v34 = vadd.f32 %v335_v25, %v334_v28  ;;  %v270_v25 = vsel %vm210_vm1, %v207_v22, 0.0  ;;  %v208_v28 = vld [vmem:[%s780_s27 + $0xf8] sm:$0xff] }
  0x36   : > { %v237_v61 = vadd.f32 %v236_v51, %v235_v55  ;;  %v345_v55 = vsel %vm210_vm1, %v299_v42, 0.0 }
  0x37   : > { %v338_v40 = vadd.f32 %v337_v31, %v336_v34  ;;  %v272_v31 = vsel %vm210_vm1, %v208_v28, 0.0 }
  0x38   : > { %v239_v3 = vadd.f32 %v238_v57, %v237_v61  ;;  %v347_v61 = vsel %vm210_vm1, %v300_v48, 0.0  ;;  %v312_v48 = vmul.f32 %v205_v10, %v205_v10 }
  0x39   : > { %v340_v46 = vadd.f32 %v339_v37, %v338_v40  ;;  %v361_v37 = vsel %vm210_vm1, %v307_v26, 0.0  ;;  %v310_v40 = vmul.f32 %v203_v62, %v203_v62 }
  0x3a   : > { %v241_v9 = vadd.f32 %v240_v63, %v239_v3  ;;  %v349_v3 = vsel %vm210_vm1, %v301_v54, 0.0 }
  0x3b   : > { %v342_v52 = vadd.f32 %v341_v43, %v340_v46 }
  0x3c   : > { %v243_v15 = vadd.f32 %v242_v5, %v241_v9  ;;  %v351_v9 = vsel %vm210_vm1, %v302_v60, 0.0  ;;  %v209_v60 = vld [vmem:[#allocation2] sm:$0x1] }
  0x3d   : > { %v344_v58 = vadd.f32 %v343_v49, %v342_v52  ;;  %v367_v49 = vsel %vm210_vm1, %v310_v40, 0.0  ;;  %v313_v52 = vmul.f32 %v206_v16, %v206_v16 }
  0x3e   : > { %v245_v21 = vadd.f32 %v244_v11, %v243_v15  ;;  %v353_v15 = vsel %vm210_vm1, %v303_v2, 0.0 }
  0x3f   : > { %v346_v0 = vadd.f32 %v345_v55, %v344_v58  ;;  %v373_v62 = vsel %vm210_vm1, %v313_v52, 0.0 }
  0x40   : > { %v247_v27 = vadd.f32 %v246_v17, %v245_v21  ;;  %v355_v21 = vsel %vm210_vm1, %v304_v8, 0.0 }
  0x41   : > { %v348_v6 = vadd.f32 %v347_v61, %v346_v0  ;;  %v315_v61 = vmul.f32 %v208_v28, %v208_v28 }
  0x42   : > { %v249_v33 = vadd.f32 %v248_v23, %v247_v27  ;;  %v357_v27 = vsel %vm210_vm1, %v305_v14, 0.0 }
  0x43   : > { %v350_v12 = vadd.f32 %v349_v3, %v348_v6  ;;  %v377_v4 = vsel %vm210_vm1, %v315_v61, 0.0 }
  0x44   : > { %v251_v39 = vadd.f32 %v250_v29, %v249_v33  ;;  %v359_v33 = vsel %vm210_vm1, %v306_v20, 0.0 }
  0x45   : > { %v352_v18 = vadd.f32 %v351_v9, %v350_v12 }
  0x46   : > { %v253_v45 = vadd.f32 %v252_v35, %v251_v39 }
  0x47   : > { %v354_v24 = vadd.f32 %v353_v15, %v352_v18 }
  0x48   : > { %v255_v51 = vadd.f32 %v254_v41, %v253_v45  ;;  %v363_v41 = vsel %vm210_vm1, %v308_v32, 0.0  ;;  %v365_v45 = vsel %vm210_vm1, %v309_v36, 0.0 }
  0x49   : > { %v356_v30 = vadd.f32 %v355_v21, %v354_v24 }
  0x4a   : > { %v257_v57 = vadd.f32 %v256_v47, %v255_v51 }
  0x4b   : > { %v358_v35 = vadd.f32 %v357_v27, %v356_v30 }
  0x4c   : > { %v259_v63 = vadd.f32 %v258_v53, %v257_v57  ;;  %v369_v53 = vsel %vm210_vm1, %v311_v44, 0.0  ;;  %v371_v57 = vsel %vm210_vm1, %v312_v48, 0.0 }
  0x4d   : > { %v360_v39 = vadd.f32 %v359_v33, %v358_v35 }
  0x4e   : > { %v261_v5 = vadd.f32 %v260_v59, %v259_v63 }
  0x4f   : > { %v362_v43 = vadd.f32 %v361_v37, %v360_v39 }
  0x50   : > { %v263_v11 = vadd.f32 %v262_v1, %v261_v5  ;;  %v375_v1 = vsel %vm210_vm1, %v314_v56, 0.0 }
  0x51   : > { %v364_v47 = vadd.f32 %v363_v41, %v362_v43 }
  0x52   : > { %v265_v17 = vadd.f32 %v264_v7, %v263_v11 }
  0x53   : > { %v366_v51 = vadd.f32 %v365_v45, %v364_v47 }
  0x54   : > { %v267_v23 = vadd.f32 %v266_v13, %v265_v17 }
  0x55   : > { %v368_v55 = vadd.f32 %v367_v49, %v366_v51 }
  0x56   : > { %v269_v29 = vadd.f32 %v268_v19, %v267_v23 }
  0x57   : > { %v370_v59 = vadd.f32 %v369_v53, %v368_v55 }
  0x58   : > { %v271_v34 = vadd.f32 %v270_v25, %v269_v29 }
  0x59   : > { %v372_v0 = vadd.f32 %v371_v57, %v370_v59 }
  0x5a   : > { %v273_v38 = vadd.f32 %v272_v31, %v271_v34 }
  0x5b   : > { %v374_v3 = vadd.f32 %v373_v62, %v372_v0 }
  0x5c   : > { %v274_v42 = vrot.slane %v273_v38, 4 }
  0x5d   : > { %v376_v5 = vadd.f32 %v375_v1, %v374_v3 }
  0x5e   : > { %v275_v46 = vadd.f32 %v274_v42, %v273_v38 }
  0x5f   : > { %v378_v6 = vadd.f32 %v377_v4, %v376_v5 }
  0x60   : > { %v276_v50 = vrot.slane %v275_v46, 2 }
  0x61   : > { %v379_v7 = vrot.slane %v378_v6, 4 }
  0x62   : > { %v277_v54 = vadd.f32 %v276_v50, %v275_v46 }
  0x63   : > { %v380_v8 = vadd.f32 %v379_v7, %v378_v6 }
  0x64   : > { %v278_v58 = vrot.slane %v277_v54, 1 }
  0x65   : > { %v381_v10 = vrot.slane %v380_v8, 2 }
  0x66   : > { %v279_v63 = vadd.f32 %v278_v58, %v277_v54 }
  0x68   : > { %v280_v2 = vadd.f32 %v279_v63, %v209_v60 }
  0x6a   : > { %282 = vst.msk [vmem:[#allocation2] sm:$0x1] %vm174_vm0, %v280_v2 }
  0x71   : > { %v390_v9 = vld [vmem:[#allocation2] sm:$0x1] }
  0x72   : > { %391 = vst.msk [vmem:[%s156_s29] sm:$0x1] %vm174_vm0, %v390_v9 }
  0x73   : > { %601 = shalt.err (!%p598_p5)
}
  0x74   : > { %s602_s20 = scalar_lea.hbm %s891_s6, 16  ;;  %s606_s25 = scalar_lea.hbm %s973_s1, 32 }
  0x75   : > { %p603_p6 = scmp.ne.s32.totalorder %s891_s6, %s602_s20  ;;  %p607_p10 = scmp.lt.u32.totalorder %s891_s6, %s973_s1 }
  0x76   : > { %p608_p11 = scmp.lt.u32.totalorder %s606_s25, %s602_s20  ;;  %p610_p13 = scmp.lt.u32.totalorder %s602_s20, %s891_s6 }
  0x77   : > { %p604_p7 = pnand %p603_p6, %p758_p4 }
  0x78   : > { %p609_p12 = por %p608_p11, %p607_p10 }
  0x79   : > { %p605_p9 = pneg %p604_p7 }
  0x7a   : > { %p611_p0 = por %p610_p13, %p609_p12 }
  0x7c   : > { %p612_p1 = pnand %p611_p0, %p605_p9 }
  0x7e   : > { %615 = shalt.err (!%p612_p1)
}
  0x7f   : > { %527 = dma.vmem_to_hbm [thread:$0]  (%p758_p4), %s884_s30, 16, %s891_s6, %s395_s7   ;;  %v382_v11 = vadd.f32 %v381_v10, %v380_v8  ;;  %v283_v13 = vld [vmem:[#allocation3] sm:$0x1] }
  0x80   : > { %s162_s29 = scalar_lea.vmem [#allocation6], %s877_s28  ;;  %s925_s30 = scalar_lea.hbm %s974_s2, %s522_s3 }
  0x81   : > { %v383_v12 = vrot.slane %v382_v11, 1  ;;  %s424_s4 = sshll.u32 %s162_s29, 4  ;;  %s399_s6 = scalar_lea.sflag [#allocation7], %s877_s28  ;;  %s918_s4 = int_to_ptr.vmem [resolvable:$true] %s424_s4 }
  0x82   : > { %s616_s7 = scalar_lea.vmem %s918_s4, 16  ;;  %s702_s15 = smov [#allocation6]  }
  0x83   : > { %v384_v14 = vadd.f32 %v383_v12, %v382_v11  ;;  %p617_p2 = scmp.ne.s32.totalorder %s918_s4, %s616_s7  ;;  %s620_s16 = sshll.u32 %s702_s15, 4  ;;  %s621_s16 = int_to_ptr.vmem [resolvable:$false] %s620_s16 }
  0x84   : > { %s622_s12 = scalar_lea.vmem %s621_s16, 32  ;;  %p623_p6 = scmp.lt.s32.totalorder %s918_s4, %s621_s16 }
  0x85   : > { %v385_v15 = vadd.f32 %v384_v14, %v283_v13  ;;  %p618_p3 = pnand %p617_p2, %p758_p4  ;;  %p624_p7 = scmp.lt.s32.totalorder %s622_s12, %s616_s7 }
  0x87   : > { %386 = vst.msk [vmem:[#allocation3] sm:$0x1] %vm174_vm0, %v385_v15  ;;  %p619_p5 = pneg %p618_p3  ;;  %p625_p9 = por %p624_p7, %p623_p6 }
  0x89   : > { %p626_p10 = pnand %p625_p9, %p619_p5 }
  0x8e   : > { %v392_v16 = vld [vmem:[#allocation3] sm:$0x1] }
  0x8f   : > { %393 = vst.msk [vmem:[%s162_s29] sm:$0x1] %vm174_vm0, %v392_v16 }
  0x90   : > { %629 = shalt.err (!%p626_p10)
}
  0x91   : > { %s630_s28 = scalar_lea.hbm %s925_s30, 16  ;;  %s634_s20 = scalar_lea.hbm %s974_s2, 32 }
  0x92   : > { %p631_p11 = scmp.ne.s32.totalorder %s925_s30, %s630_s28  ;;  %p635_p0 = scmp.lt.u32.totalorder %s925_s30, %s974_s2 }
  0x93   : > { %p636_p1 = scmp.lt.u32.totalorder %s634_s20, %s630_s28  ;;  %p638_p3 = scmp.lt.u32.totalorder %s630_s28, %s925_s30 }
  0x94   : > { %p632_p12 = pnand %p631_p11, %p758_p4 }
  0x95   : > { %p637_p2 = por %p636_p1, %p635_p0 }
  0x96   : > { %p633_p13 = pneg %p632_p12 }
  0x97   : > { %p639_p5 = por %p638_p3, %p637_p2 }
  0x99   : > { %p640_p6 = pnand %p639_p5, %p633_p13 }
  0x9b   : > { %643 = shalt.err (!%p640_p6)
}
  0x9c   : > { %528 = dma.vmem_to_hbm [thread:$0]  (%p758_p4), %s918_s4, 16, %s925_s30, %s399_s6  }
  0x9d PF: > { %p538_p7 = scmp.ge.s32.totalorder %s698_s14, 2  ;;  %s436_s25 = sand.u32 1, %s678_s9  }
  0x9e   : > { %s437_s26 = scalar_lea.sflag [#allocation5], %s436_s25 }
  0x9f   : > { %p532_p9 = pnand %p538_p7, %p765_p8 }
  0xa1   : > { %669 = dma.done.wait (!%p532_p9), %s437_s26, 16  }
  0xa2   : > { %671 = vsyncadd (!%p532_p9), %s437_s26, 4294967280  ;;  %s445_s27 = scalar_lea.sflag [#allocation7], %s436_s25 }
  0xa3   : > { %673 = dma.done.wait (!%p532_p9), %s445_s27, 16  }
  0xa4   : > { %675 = vsyncadd (!%p532_p9), %s445_s27, 4294967280  ;;  %s19_s14 = sadd.s32 1, %s698_s14   ;;  %s977_s9 = smov %s682_s10 }
  0xa5   : > { %p16_p10 = scmp.ge.s32.totalorder %s19_s14, 4   ;;  %s978_s10 = smov %s686_s11 }
  0xa6   : > { %s979_s11 = smov %s771_s22  ;;  %s980_s12 = smov %s694_s13 }
  0xa7   : > { %s981_s13 = smov %s983_s17  ;;  %18 = sbr.rel (!%p16_p10) target bundleno = 6 (0x6), region = 84 }
  0xae   :  { %449 = vsyncpa [#allocation5], 1 }
  0xaf   :  { %451 = vsyncpa [#allocation5 + $0x1], 1 }
  0xb0   :  { %452 = vsyncpa [#allocation7], 1 }
  0xb1   :  { %454 = vsyncpa [#allocation7 + $0x1], 1 }

</bundles_post_ra>
